<compile_context>
chip_gen: v7x
topology: tpu7x:2x2x1
jax: 0.10.0
libtpu: 0.0.40
codegen_flags: <defaults>
</compile_context>

<pallas_src>
import jax
import jax.numpy as jnp
from jax.experimental import pallas as pl
from jax.experimental.pallas import tpu as pltpu


# ---------------- shape helpers (mirror the PyTorch reference) ----------------

def _remove_dim_get_shape(curr_shape, dim):
    assert dim > 0, "Axis must be greater than 0"
    curr_shape = list(curr_shape)
    axis_shape = curr_shape.pop(dim)
    curr_shape[dim - 1] *= axis_shape
    return curr_shape


def _compute_new_shape(shape, dim):
    curr_shape = list(shape)
    if isinstance(dim, int):
        return _remove_dim_get_shape(curr_shape, dim)
    for ax in sorted(dim, reverse=True):
        curr_shape = _remove_dim_get_shape(curr_shape, ax)
    return curr_shape


# ---------------- primary copy path: direct HBM -> HBM DMA --------------------

def _dma_copy_kernel(x_hbm_ref, o_hbm_ref, sem):
    # Pure copy never needs the data in vregs: one full-array DMA, HBM -> HBM.
    copy = pltpu.make_async_copy(x_hbm_ref, o_hbm_ref, sem)
    copy.start()
    copy.wait()


def _pallas_dma_copy(x):
    """Materialize a fresh buffer with the same shape/contents as `x`."""
    nbytes = x.size * x.dtype.itemsize
    return pl.pallas_call(
        _dma_copy_kernel,
        out_shape=jax.ShapeDtypeStruct(x.shape, x.dtype),
        in_specs=[pl.BlockSpec(memory_space=pl.ANY)],
        out_specs=pl.BlockSpec(memory_space=pl.ANY),
        scratch_shapes=[pltpu.SemaphoreType.DMA],
        cost_estimate=pl.CostEstimate(
            flops=0, transcendentals=0, bytes_accessed=2 * nbytes),
    )(x)


# ---------------- fallback copy path: tiled VMEM round-trip -------------------

def _tile_bytes_for_chip():
    """Generation-aware per-tile byte cap for the tiled fallback path."""
    try:
        vmem = int(pltpu.get_tpu_info().vmem_capacity_bytes)
    except Exception:
        vmem = 64 << 20  # conservative (v7x per-TC VMEM)
    if vmem >= (96 << 20):   # v5e / v6e: 128 MiB VMEM
        return 8 << 20
    return 6 << 20           # v7x: 64 MiB per TC


def _vmem_limit_bytes(tile_bytes_actual):
    # Double-buffered input + output = 4 x tile, plus headroom for the compiler.
    return int(min(100 << 20, 4 * tile_bytes_actual + (16 << 20)))


def _pick_lane_dense_layout(n_elems, itemsize):
    """Return (rows, cols, tile_rows) for a lane-dense tiled copy, or None."""
    sublane = max(8, 32 // max(1, itemsize))   # 8 f32 / 16 bf16 / 32 int8
    cols = None
    for c in (2048, 1024, 512, 256, 128):
        if n_elems % c == 0:
            if cols is None:
                cols = c                       # largest lane-dense divisor
            if n_elems // c >= sublane:
                cols = c                       # ... with a full sublane group
                break
    if cols is None:
        return None                            # not lane-dense -> use DMA path
    rows = n_elems // cols

    tile_cap = _tile_bytes_for_chip()
    max_rows_by_vmem = max(sublane, tile_cap // max(1, cols * itemsize))
    # Guarantee >= 4 grid steps for multi-MiB copies so the pipeline (and the
    # 2 TensorCores on v7x) actually overlap inbound/outbound DMAs.
    if n_elems * itemsize > (4 << 20):
        max_rows_by_grid = -(-rows // 4)
    else:
        max_rows_by_grid = rows

    tile_rows = min(rows, max_rows_by_vmem, max_rows_by_grid)
    if tile_rows < rows:
        # Round to the dtype's packed sublane multiple (dense vst path).
        tile_rows = max(sublane, (tile_rows // sublane) * sublane)
        tile_rows = min(tile_rows, rows)
    return rows, cols, int(tile_rows)


def _copy_kernel(x_ref, o_ref):
    # In/out blocks share the same (already collapsed) 2-D shape, so the body
    # is a straight vld/vst copy — no in-kernel reshape / relayout.
    o_ref[...] = x_ref[...]


def _pallas_tiled_copy(x, new_shape):
    n = x.size
    itemsize = x.dtype.itemsize
    layout = _pick_lane_dense_layout(n, itemsize)
    if layout is None:
        # Odd flat sizes (not a multiple of 128) would degenerate into masked
        # stores / a single giant tile; the DMA path handles them at full BW.
        return _pallas_dma_copy(jnp.reshape(x, new_shape))

    rows, cols, tile_rows = layout
    x2d = jnp.reshape(x, (rows, cols))          # metadata-only
    tile_bytes_actual = tile_rows * cols * itemsize

    y2d = pl.pallas_call(
        _copy_kernel,
        out_shape=jax.ShapeDtypeStruct((rows, cols), x.dtype),
        grid=(-(-rows // tile_rows),),
        in_specs=[pl.BlockSpec((tile_rows, cols), lambda i: (i, 0))],
        out_specs=pl.BlockSpec((tile_rows, cols), lambda i: (i, 0)),
        compiler_params=pltpu.CompilerParams(
            dimension_semantics=("parallel",),
            vmem_limit_bytes=_vmem_limit_bytes(tile_bytes_actual)),
        cost_estimate=pl.CostEstimate(
            flops=0, transcendentals=0, bytes_accessed=2 * n * itemsize),
    )(x2d)

    return jnp.reshape(y2d, new_shape)          # metadata-only


# ---------------- public API ---------------------------------------------------

def remove_dim(x, dim, force_pallas_copy=False, copy_impl="dma"):
    """RemoveDim(dim).forward(x).

    Default: merging adjacent axes of a contiguous row-major array never moves
    data, so this is a free metadata reshape. `force_pallas_copy=True`
    materializes a fresh buffer; `copy_impl` selects the HBM->HBM DMA kernel
    ("dma", default) or the tiled VMEM copy ("tiled", fallback).
    """
    new_shape = tuple(int(s) for s in _compute_new_shape(x.shape, dim))
    if not force_pallas_copy or x.size == 0:
        return jnp.reshape(x, new_shape)
    if copy_impl == "tiled":
        return _pallas_tiled_copy(x, new_shape)
    return _pallas_dma_copy(jnp.reshape(x, new_shape))


class RemoveDim:
    """Mirror of the PyTorch nn.Module (no parameters)."""

    def __init__(self, dim, force_pallas_copy=False, copy_impl="dma"):
        self.dim = dim
        self.force_pallas_copy = force_pallas_copy
        self.copy_impl = copy_impl

    def __call__(self, input_tensor):
        return remove_dim(input_tensor, self.dim,
                          self.force_pallas_copy, self.copy_impl)


# ---------------- self-test ----------------------------------------------------

if __name__ == "__main__":
    key = jax.random.PRNGKey(0)
    # NCHW-style input, small shapes.
    x = jax.random.normal(key, (2, 4, 16, 16), dtype=jnp.float32)

    # Case 1: single int dim -> merge C into N: (2,4,16,16) -> (8,16,16)
    ref1 = jnp.reshape(x, (8, 16, 16))
    fast1 = jax.block_until_ready(RemoveDim(dim=1)(x))
    dma1 = jax.block_until_ready(
        RemoveDim(dim=1, force_pallas_copy=True)(x))
    tiled1 = jax.block_until_ready(
        RemoveDim(dim=1, force_pallas_copy=True, copy_impl="tiled")(x))
    assert fast1.shape == ref1.shape and jnp.array_equal(fast1, ref1), "fast dim=1"
    assert dma1.shape == ref1.shape and jnp.array_equal(dma1, ref1), "dma dim=1"
    assert tiled1.shape == ref1.shape and jnp.array_equal(tiled1, ref1), "tiled dim=1"

    # Case 2: list of dims -> (2,4,16,16) -> (128,16)
    ref2 = jnp.reshape(x, (128, 16))
    fast2 = jax.block_until_ready(RemoveDim(dim=[1, 2])(x))
    dma2 = jax.block_until_ready(
        RemoveDim(dim=[1, 2], force_pallas_copy=True)(x))
    tiled2 = jax.block_until_ready(
        RemoveDim(dim=[1, 2], force_pallas_copy=True, copy_impl="tiled")(x))
    assert fast2.shape == ref2.shape and jnp.array_equal(fast2, ref2), "fast dim=[1,2]"
    assert dma2.shape == ref2.shape and jnp.array_equal(dma2, ref2), "dma dim=[1,2]"
    assert tiled2.shape == ref2.shape and jnp.array_equal(tiled2, ref2), "tiled dim=[1,2]"

    # Case 3: bf16 (packed-sublane dtype) through both copy paths.
    xb = x.astype(jnp.bfloat16)
    refb = jnp.reshape(xb, (8, 16, 16))
    dmab = jax.block_until_ready(RemoveDim(dim=1, force_pallas_copy=True)(xb))
    tiledb = jax.block_until_ready(
        RemoveDim(dim=1, force_pallas_copy=True, copy_impl="tiled")(xb))
    assert jnp.array_equal(dmab, refb), "dma bf16"
    assert jnp.array_equal(tiledb, refb), "tiled bf16"

    # Case 4: odd shape whose element count is not a multiple of 128
    # (tiled request routes to the DMA path; no masked-store degradation).
    xo = jax.random.normal(jax.random.PRNGKey(1), (5, 7, 3), dtype=jnp.float32)
    refo = jnp.reshape(xo, (5, 21))
    dmao = jax.block_until_ready(RemoveDim(dim=2, force_pallas_copy=True)(xo))
    tiledo = jax.block_until_ready(
        RemoveDim(dim=2, force_pallas_copy=True, copy_impl="tiled")(xo))
    assert dmao.shape == refo.shape and jnp.array_equal(dmao, refo), "dma odd"
    assert tiledo.shape == refo.shape and jnp.array_equal(tiledo, refo), "tiled odd"

    print("KERNEL_OK")
</pallas_src>

<mosaic_0001>
module attributes {stable_mosaic.version = 11 : i64} {
  func.func @_dma_copy_kernel(%arg0: memref<8x16x16xf32, #tpu.memory_space<any>>, %arg1: memref<8x16x16xf32, #tpu.memory_space<any>>, %arg2: memref<!tpu.dma_semaphore, #tpu.memory_space<semaphore_mem>>) attributes {dimension_semantics = [], scalar_prefetch = 0 : i64, scratch_operands = 1 : i64, tpu.core_type = #tpu.core_type<tc>} {
    tpu.enqueue_dma source(%arg0 : memref<8x16x16xf32, #tpu.memory_space<any>>) target(%arg1 : memref<8x16x16xf32, #tpu.memory_space<any>>) target_semaphore(%arg2 : memref<!tpu.dma_semaphore, #tpu.memory_space<semaphore_mem>>)
    tpu.wait_dma2 semaphore(%arg2 : memref<!tpu.dma_semaphore, #tpu.memory_space<semaphore_mem>>) src(%arg0 : memref<8x16x16xf32, #tpu.memory_space<any>>) dst(%arg1 : memref<8x16x16xf32, #tpu.memory_space<any>>)
    return
  }
}

</mosaic_0001>

<bundles_post_ra>
// kernel: tpu_custom_call.1
= control target key start
LH: loop header
LB: loop body
LE: loop exit
PB: predicated region body
PF: predicated region fallthrough
CT: control target
= control target key end

     0   :  { %s35_s6 = smov [#allocation2]   ;;  %s36_s7 = smov [#allocation3]   ;;  %s54_s0 = inlined_call_operand.hbm [shape: f32[8,16,16], index: 0, kind: input, shape index: {}]   ;;  %s55_s1 = inlined_call_operand.hbm [shape: f32[8,16,16], index: 1, kind: output, shape index: {}]  }
   0x1   :  { %s37_s8 = smov 0  }
   0x2   :  { %18 = dma.general %s54_s0, 2048, %s55_s1, %s35_s6, %s36_s7, [#allocation4], %s37_s8, 0  }
   0x3   :  { %33 = dma.done.wait [#allocation2], 2048 }
   0x4   :  { %34 = vsyncadd [#allocation2], 4294965248 }
   0x5   :  { %23 = vsyncmov [#allocation2] }
   0x8   :  { %s24_s13 = vpop.sfrf %23 }
   0x9   :  { %p29_p0 = scmp.ne.s32.totalorder %s24_s13, 0 }
   0xb   :  { %28 = shalt.err (%p29_p0)  }

</bundles_post_ra>
